<compile_context>
chip_gen: v7x
topology: tpu7x:2x2x1
jax: 0.10.0
libtpu: 0.0.40
codegen_flags: <defaults>
</compile_context>

<pallas_src>
import math
import functools

import jax
import jax.numpy as jnp
from jax.experimental import pallas as pl
from jax.experimental.pallas import tpu as pltpu


def _round_up(x, m):
    return ((x + m - 1) // m) * m


def _stable_sigmoid(y):
    # numerically stable sigmoid (no inf intermediates), EUP tanh path
    return 0.5 * (jnp.tanh(0.5 * y) + 1.0)


# ---------------------------------------------------------------------------
# Pallas kernels
# ---------------------------------------------------------------------------
def _dense_kernel(x_ref, w_ref, b_ref, o_ref, *, act):
    """o = act(x @ w + b); one row-tile per grid step."""
    y = jnp.dot(x_ref[...], w_ref[...], preferred_element_type=jnp.float32) + b_ref[...]
    if act == "relu":
        y = jnp.maximum(y, 0.0)
    elif act == "sigmoid":
        y = _stable_sigmoid(y)
    o_ref[...] = y


def dense(x, w, b, *, act="none", tile_rows=512):
    """Row-tiled dense layer. Handles arbitrary row counts via padding."""
    R, K = x.shape
    N = w.shape[1]
    TR = tile_rows if R >= tile_rows else _round_up(R, 8)
    Rp = _round_up(R, TR)
    xp = jnp.pad(x, ((0, Rp - R), (0, 0))) if Rp != R else x
    out = pl.pallas_call(
        functools.partial(_dense_kernel, act=act),
        out_shape=jax.ShapeDtypeStruct((Rp, N), jnp.float32),
        grid=(Rp // TR,),
        in_specs=[
            pl.BlockSpec((TR, K), lambda i: (i, 0)),
            pl.BlockSpec((K, N), lambda i: (0, 0)),
            pl.BlockSpec((1, N), lambda i: (0, 0)),
        ],
        out_specs=pl.BlockSpec((TR, N), lambda i: (i, 0)),
        compiler_params=pltpu.CompilerParams(
            dimension_semantics=("parallel",),
            vmem_limit_bytes=32 * 1024 * 1024),
    )(xp, w, b)
    return out[:R] if Rp != R else out


def _meta_kernel(offs_ref, patch_ref, w1_ref, b1_ref, wf_ref, bf_ref, b3_ref,
                 o_ref, wpred_ref, *, Cp):
    """Fused MUM: weight-prediction MLP + per-pixel meta-upscale + to_3_channels + Sigmoid.

    Grid = (pixel_tile, batch) with batch innermost.

    offs_ref  : (TP, 8)        HR-pixel offset vectors (padded to 8 cols)     f32
    patch_ref : (1, TP, Cp)    gathered LR feature patches (C padded to 128)  bf16
    w1_ref    : (8, hidden)    wpn layer-1 weight (rows padded to 8)          f32
    b1_ref    : (1, hidden)                                                   f32
    wf_ref    : (hidden, 3*Cp) wpn layer-2 weight, w3-folded, C-padded        bf16
    bf_ref    : (1, 3*Cp)      wpn layer-2 bias,   w3-folded, C-padded        f32
    b3_ref    : (1, 3)         to_3_channels bias                             f32
    o_ref     : (1, TP, 3)
    wpred_ref : (TP, 3*Cp)     VMEM scratch, reused across the batch axis     f32
    """
    # Predicted (w3-folded) per-pixel conv weights: compute once per pixel tile,
    # reuse for every batch element (batch is the inner, "arbitrary" grid axis).
    @pl.when(pl.program_id(1) == 0)
    def _():
        h = jnp.dot(offs_ref[...], w1_ref[...], preferred_element_type=jnp.float32)
        h = jnp.maximum(h + b1_ref[...], 0.0)                       # (TP, hidden) f32
        wp = jnp.dot(h.astype(jnp.bfloat16), wf_ref[...],
                     preferred_element_type=jnp.float32)            # MXU, bf16 operands
        wpred_ref[...] = wp + bf_ref[...]                           # (TP, 3*Cp) f32

    patch = patch_ref[0].astype(jnp.float32)                        # (TP, Cp), f32 VPU math
    # Three lane-aligned (multiple-of-128) slices of the predicted weights -> 3 reductions.
    s0 = jnp.sum(patch * wpred_ref[:, 0 * Cp:1 * Cp], axis=-1, keepdims=True)
    s1 = jnp.sum(patch * wpred_ref[:, 1 * Cp:2 * Cp], axis=-1, keepdims=True)
    s2 = jnp.sum(patch * wpred_ref[:, 2 * Cp:3 * Cp], axis=-1, keepdims=True)
    y = jnp.concatenate([s0, s1, s2], axis=-1) + b3_ref[...]        # (TP, 3)
    o_ref[0] = _stable_sigmoid(y)


def meta_upscale_to3_fused(patches, offsets, w1, b1, wf, bf, b3, *, Cp, tile_rows=512):
    """patches: (B, P, Cp) bf16, offsets: (P, 8) f32 -> (B, P, 3) f32."""
    B, P, _ = patches.shape
    TP = tile_rows if P >= tile_rows else _round_up(P, 8)
    Pp = _round_up(P, TP)
    if Pp != P:
        patches = jnp.pad(patches, ((0, 0), (0, Pp - P), (0, 0)))
        offsets = jnp.pad(offsets, ((0, Pp - P), (0, 0)))
    hidden = w1.shape[1]
    out = pl.pallas_call(
        functools.partial(_meta_kernel, Cp=Cp),
        out_shape=jax.ShapeDtypeStruct((B, Pp, 3), jnp.float32),
        grid=(Pp // TP, B),
        in_specs=[
            pl.BlockSpec((TP, offsets.shape[1]), lambda t, b: (t, 0)),
            pl.BlockSpec((1, TP, Cp), lambda t, b: (b, t, 0)),
            pl.BlockSpec((w1.shape[0], hidden), lambda t, b: (0, 0)),   # resident in VMEM
            pl.BlockSpec((1, hidden), lambda t, b: (0, 0)),
            pl.BlockSpec((hidden, 3 * Cp), lambda t, b: (0, 0)),
            pl.BlockSpec((1, 3 * Cp), lambda t, b: (0, 0)),
            pl.BlockSpec((1, 3), lambda t, b: (0, 0)),
        ],
        out_specs=pl.BlockSpec((1, TP, 3), lambda t, b: (b, t, 0)),
        scratch_shapes=[pltpu.VMEM((TP, 3 * Cp), jnp.float32)],
        compiler_params=pltpu.CompilerParams(
            dimension_semantics=("parallel", "arbitrary"),
            vmem_limit_bytes=32 * 1024 * 1024),
    )(offsets, patches, w1, b1, wf, bf, b3)
    return out[:, :P] if Pp != P else out


# ---------------------------------------------------------------------------
# Plain-JAX glue (offset generation, im2col, gather, trace-time weight folding)
# ---------------------------------------------------------------------------
def wpm_input(r, hr_size):
    """WPM_Input: offset vector (P, 8) = (frac_i, frac_j, 1/r, 0...) per HR pixel."""
    HH, HW = hr_size
    i = jnp.arange(HH, dtype=jnp.float32)
    j = jnp.arange(HW, dtype=jnp.float32)
    oi = i / r - jnp.floor(i / r)
    oj = j / r - jnp.floor(j / r)
    OI = jnp.repeat(oi, HW)
    OJ = jnp.tile(oj, HH)
    scale = jnp.full((HH * HW,), 1.0 / r, dtype=jnp.float32)
    off = jnp.stack([OI, OJ, scale], axis=-1)              # (P, 3)
    return jnp.pad(off, ((0, 0), (0, 5)))                  # pad feature dim 3 -> 8


def im2col_3x3(x):
    """x: (B, H, W, Cin) -> (B*H*W, 9*Cin), zero pad=1."""
    B, H, W, Cin = x.shape
    xp = jnp.pad(x, ((0, 0), (1, 1), (1, 1), (0, 0)))
    cols = [xp[:, di:di + H, dj:dj + W, :] for di in range(3) for dj in range(3)]
    cols = jnp.concatenate(cols, axis=-1)
    return cols.reshape(B * H * W, 9 * Cin)


def flm(I_LR, w_flm, b_flm, inC):
    """FLM: 3x3 conv (3 -> inC) + ReLU via im2col + Pallas dense kernel."""
    B, H, W, _ = I_LR.shape
    cols = im2col_3x3(I_LR)
    feat = dense(cols, w_flm, b_flm, act="relu")
    return feat.reshape(B, H, W, inC)


def gather_lr_patches(F_LR, hr_size, r, k, Cp):
    """For each HR pixel, gather the kxk LR feature patch around (floor(i/r), floor(j/r)).

    Returns (B, P, Cp) bf16, channel dim zero-padded up to Cp (lane-aligned)."""
    B, H, W, inC = F_LR.shape
    HH, HW = hr_size
    pad = k // 2
    Fp = jnp.pad(F_LR, ((0, 0), (pad, pad), (pad, pad), (0, 0)))
    li = jnp.clip(jnp.floor(jnp.arange(HH, dtype=jnp.float32) / r).astype(jnp.int32), 0, H - 1)
    lj = jnp.clip(jnp.floor(jnp.arange(HW, dtype=jnp.float32) / r).astype(jnp.int32), 0, W - 1)
    pi = jnp.repeat(li, HW)                                 # (P,)
    pj = jnp.tile(lj, HH)                                   # (P,)
    rows = pi[:, None] + jnp.arange(k)[None, :]             # (P, k) (already offset by pad)
    cols = pj[:, None] + jnp.arange(k)[None, :]             # (P, k)
    patches = Fp[:, rows[:, :, None], cols[:, None, :], :]  # (B, P, k, k, inC)
    patches = patches.reshape(B, HH * HW, k * k * inC)
    C = k * k * inC
    patches = jnp.pad(patches, ((0, 0), (0, 0), (0, Cp - C)))
    return patches.astype(jnp.bfloat16)


def fold_wpn2_with_w3(w_wpn2, b_wpn2, w3, *, outC, C, Cp):
    """Fold the to_3_channels 1x1 conv weight into the second WPN layer (trace time).

    sum_o (patch . wpred_o) * w3[o, :] == patch . (sum_o wpred_o * w3[o, :])
    so the predicted weights shrink from outC*C to 3*C per pixel."""
    hid = w_wpn2.shape[0]
    wf = jnp.einsum("hoc,ot->htc", w_wpn2.reshape(hid, outC, C), w3)   # (hid, 3, C)
    wf = jnp.pad(wf, ((0, 0), (0, 0), (0, Cp - C))).reshape(hid, 3 * Cp)
    bf = jnp.einsum("oc,ot->tc", b_wpn2.reshape(outC, C), w3)          # (3, C)
    bf = jnp.pad(bf, ((0, 0), (0, Cp - C))).reshape(1, 3 * Cp)
    return wf.astype(jnp.bfloat16), bf.astype(jnp.float32)


# ---------------------------------------------------------------------------
# MetaSR forward
# ---------------------------------------------------------------------------
def metasr_forward(I_LR, r, params, *, k, inC, outC):
    B, H, W, _ = I_LR.shape
    HH, HW = math.floor(H * r), math.floor(W * r)
    C = k * k * inC
    Cp = _round_up(C, 128)          # lane-aligned patch-channel width

    # WPM_Input
    offsets = wpm_input(r, (HH, HW))                                   # (P, 8) f32
    # FLM
    F_LR = flm(I_LR, params["w_flm"], params["b_flm"], inC)            # (B, H, W, inC)
    # Trace-time folding of w_wpn2/b_wpn2 with the to_3_channels 1x1 conv weight
    wf, bf = fold_wpn2_with_w3(params["w_wpn2"], params["b_wpn2"], params["w3"],
                               outC=outC, C=C, Cp=Cp)
    w1 = jnp.pad(params["w_wpn1"], ((0, 8 - params["w_wpn1"].shape[0]), (0, 0)))  # (8, hidden)
    # Patch gather (XLA glue), padded + bf16
    patches = gather_lr_patches(F_LR, (HH, HW), r, k, Cp)              # (B, P, Cp) bf16
    # Fused MUM (WPN MLP + meta-upscale) + to_3_channels + Sigmoid
    out = meta_upscale_to3_fused(patches, offsets, w1, params["b_wpn1"],
                                 wf, bf, params["b3"], Cp=Cp)
    return out.reshape(B, HH, HW, 3)                                   # NHWC result


if __name__ == "__main__":
    B, H, W = 2, 16, 16
    k, inC, outC = 3, 8, 8
    hidden = 256
    r = 2.0
    C = k * k * inC

    key = jax.random.PRNGKey(0)
    ks = jax.random.split(key, 8)
    params = dict(
        w_flm=0.1 * jax.random.normal(ks[0], (9 * 3, inC), jnp.float32),
        b_flm=jnp.zeros((1, inC), jnp.float32),
        w_wpn1=0.1 * jax.random.normal(ks[1], (3, hidden), jnp.float32),
        b_wpn1=0.01 * jax.random.normal(ks[2], (1, hidden), jnp.float32),
        w_wpn2=0.1 * jax.random.normal(ks[3], (hidden, outC * C), jnp.float32),
        b_wpn2=0.01 * jax.random.normal(ks[4], (1, outC * C), jnp.float32),
        w3=0.1 * jax.random.normal(ks[5], (outC, 3), jnp.float32),
        b3=jnp.zeros((1, 3), jnp.float32),
    )
    # NHWC input (PyTorch equivalent: NCHW (2, 3, 16, 16))
    I_LR = jax.random.uniform(ks[6], (B, H, W, 3), jnp.float32)

    out = metasr_forward(I_LR, r, params, k=k, inC=inC, outC=outC)
    out = jax.block_until_ready(out)
    assert out.shape == (B, math.floor(H * r), math.floor(W * r), 3), out.shape
    assert bool(jnp.all(jnp.isfinite(out)))
    assert bool(jnp.all((out >= 0.0) & (out <= 1.0)))
    print("KERNEL_OK")
</pallas_src>

<mosaic_0001>
module attributes {stable_mosaic.version = 11 : i64} {
  func.func @_dense_kernel(%arg0: i32, %arg1: memref<512x27xf32, #tpu.memory_space<vmem>>, %arg2: memref<27x8xf32, #tpu.memory_space<vmem>>, %arg3: memref<1x8xf32, #tpu.memory_space<vmem>>, %arg4: memref<512x8xf32, #tpu.memory_space<vmem>>) attributes {dimension_semantics = [#tpu.dimension_semantics<parallel>], iteration_bounds = array<i64: 1>, scalar_prefetch = 0 : i64, scratch_operands = 0 : i64, tpu.core_type = #tpu.core_type<tc>, window_params = [{transform_indices = @transform_0, window_bounds = array<i64: 512, 27>}, {pipeline_mode = #tpu.pipeline_mode<synchronous>, transform_indices = @transform_1, window_bounds = array<i64: 27, 8>}, {pipeline_mode = #tpu.pipeline_mode<synchronous>, transform_indices = @transform_2, window_bounds = array<i64: 1, 8>}, {transform_indices = @transform_3, window_bounds = array<i64: 512, 8>}]} {
    %c0 = arith.constant 0 : index
    %c0_0 = arith.constant 0 : index
    %0 = vector.load %arg1[%c0, %c0_0] : memref<512x27xf32, #tpu.memory_space<vmem>>, vector<512x27xf32>
    %c0_1 = arith.constant 0 : index
    %c0_2 = arith.constant 0 : index
    %1 = vector.load %arg2[%c0_1, %c0_2] : memref<27x8xf32, #tpu.memory_space<vmem>>, vector<27x8xf32>
    %cst = arith.constant dense<0.000000e+00> : vector<512x8xf32>
    %2 = tpu.matmul %0, %1, %cst {dimension_numbers = #tpu.dot_dimension_numbers<[1], [0], [0], [1], [0, 0, 1, 1], [], []>} : vector<512x27xf32>, vector<27x8xf32>, vector<512x8xf32> -> vector<512x8xf32>
    %c0_3 = arith.constant 0 : index
    %c0_4 = arith.constant 0 : index
    %3 = vector.load %arg3[%c0_3, %c0_4] : memref<1x8xf32, #tpu.memory_space<vmem>>, vector<1x8xf32>
    %4 = vector.broadcast %3 : vector<1x8xf32> to vector<512x8xf32>
    %5 = arith.addf %2, %4 : vector<512x8xf32>
    %cst_5 = arith.constant 0.000000e+00 : f32
    %6 = vector.broadcast %cst_5 : f32 to vector<512x8xf32>
    %7 = arith.maximumf %5, %6 : vector<512x8xf32>
    %c0_6 = arith.constant 0 : index
    %c0_7 = arith.constant 0 : index
    %8 = vector.load %arg4[%c0_6, %c0_7] : memref<512x8xf32, #tpu.memory_space<vmem>>, vector<512x8xf32>
    tpu.vector_store %arg4[%c0_6, %c0_7], %7 {strides = array<i32>} : memref<512x8xf32, #tpu.memory_space<vmem>>, vector<512x8xf32>,
    return
  }
  func.func @transform_0(%arg0: i32) -> (i32, i32) {
    %c0_i32 = arith.constant 0 : i32
    %c0_i32_0 = arith.constant 0 : i32
    return %arg0, %c0_i32 : i32, i32
  }
  func.func @transform_1(%arg0: i32) -> (i32, i32) {
    %c0_i32 = arith.constant 0 : i32
    %c0_i32_0 = arith.constant 0 : i32
    %c0_i32_1 = arith.constant 0 : i32
    return %c0_i32, %c0_i32_0 : i32, i32
  }
  func.func @transform_2(%arg0: i32) -> (i32, i32) {
    %c0_i32 = arith.constant 0 : i32
    %c0_i32_0 = arith.constant 0 : i32
    %c0_i32_1 = arith.constant 0 : i32
    return %c0_i32, %c0_i32_0 : i32, i32
  }
  func.func @transform_3(%arg0: i32) -> (i32, i32) {
    %c0_i32 = arith.constant 0 : i32
    %c0_i32_0 = arith.constant 0 : i32
    return %arg0, %c0_i32 : i32, i32
  }
}

</mosaic_0001>

<bundles_post_ra>
// kernel: tpu_custom_call.1
= control target key start
LH: loop header
LB: loop body
LE: loop exit
PB: predicated region body
PF: predicated region fallthrough
CT: control target
= control target key end

     0   :  { %vm282_vm0 = vcmask 1042432   ;;  %vm89_vm1 = vcmask 220160   ;;  %vm1057_vm2 = vmmov 1   ;;  %vm735_vm4 = vcmask 64512   ;;  %s1671_s1 = inlined_call_operand.vmem [shape: f32[27,8], index: 1, kind: input, shape index: {}]   ;;  %s1672_s0 = inlined_call_operand.vmem [shape: f32[512,27], index: 0, kind: input, shape index: {}]   ;;  %s1673_s2 = inlined_call_operand.vmem [shape: f32[1,8], index: 2, kind: input, shape index: {}]   ;;  %s1674_s3 = inlined_call_operand.vmem [shape: f32[512,8], index: 3, kind: output, shape index: {}]  }
   0x1   :  { %v78_v0 = vld [vmem:[%s1671_s1] sm:$0xff]  ;;  %v79_v1 = vld [vmem:[%s1671_s1 + $0x8] sm:$0xff]  ;;  %v80_v2 = vld [vmem:[%s1671_s1 + $0x10] sm:$0xff] }
   0x2   :  { %v1042_v3 = vpack.c.bf16 %v79_v1, %v78_v0  ;;  %v81_v4 = vld [vmem:[%s1671_s1 + $0x18] sm:$0x7]  ;;  %v14_v5 = vld [vmem:[%s1672_s0] sm:$0xff]  ;;  %vm1047_vm3 = vmpackc.low %vm282_vm0, %vm1057_vm2 }
   0x3   :  { %v1046_v6 = vpack.c.bf16 %v81_v4, %v80_v2  ;;  %946 = vmatprep.mubr.msk.f32.mxu0 %vm89_vm1, %v14_v5  ;;  %v46_v7 = vld [vmem:[%s1672_s0 + $0x100] sm:$0xff]  ;;  %v15_v8 = vld [vmem:[%s1672_s0 + $0x8] sm:$0xff]  ;;  %v16_v10 = vld [vmem:[%s1672_s0 + $0x10] sm:$0xff] }
   0x4   :  { %1043 = vmatprep.subr.bf16.mxu0 %v1042_v3  ;;  %1052 = vmatprep.subr.bf16.mxu1 %v1042_v3  ;;  %v47_v9 = vld [vmem:[%s1672_s0 + $0x108] sm:$0xff]  ;;  %v48_v11 = vld [vmem:[%s1672_s0 + $0x110] sm:$0xff]  ;;  %v17_v12 = vld [vmem:[%s1672_s0 + $0x18] sm:$0xff] }
   0x5   :  { %1045 = vmatpush3.bf16.msra.mxu0 %v1042_v3  ;;  %1054 = vmatpush3.bf16.msra.mxu1 %v1042_v3  ;;  %v49_v13 = vld [vmem:[%s1672_s0 + $0x118] sm:$0xff]  ;;  %v18_v14 = vld [vmem:[%s1672_s0 + $0x20] sm:$0xff]  ;;  %v19_v16 = vld [vmem:[%s1672_s0 + $0x28] sm:$0xff] }
   0x6   :  { %1048 = vmatprep.subr.msk.bf16.mxu0 %vm1047_vm3, %v1046_v6  ;;  %1053 = vmatprep.subr.msk.bf16.mxu1 %vm1047_vm3, %v1046_v6  ;;  %v50_v15 = vld [vmem:[%s1672_s0 + $0x120] sm:$0xff]  ;;  %v51_v17 = vld [vmem:[%s1672_s0 + $0x128] sm:$0xff]  ;;  %v20_v18 = vld [vmem:[%s1672_s0 + $0x30] sm:$0xff] }
   0x7   :  { %994 = vmatprep.mubr.msk.f32.mxu1 %vm89_vm1, %v46_v7  ;;  %v52_v19 = vld [vmem:[%s1672_s0 + $0x130] sm:$0xff]  ;;  %v21_v20 = vld [vmem:[%s1672_s0 + $0x38] sm:$0xff]  ;;  %v22_v22 = vld [vmem:[%s1672_s0 + $0x40] sm:$0xff] }
   0x8   :  { %v53_v21 = vld [vmem:[%s1672_s0 + $0x138] sm:$0xff]  ;;  %v54_v23 = vld [vmem:[%s1672_s0 + $0x140] sm:$0xff]  ;;  %v23_v24 = vld [vmem:[%s1672_s0 + $0x48] sm:$0xff] }
   0x9   :  { %1051 = vmatpush3.bf16.msk.msra.mxu0 %vm1047_vm3, %v1046_v6  ;;  %1055 = vmatpush3.bf16.msk.msra.mxu1 %vm1047_vm3, %v1046_v6  ;;  %v55_v25 = vld [vmem:[%s1672_s0 + $0x148] sm:$0xff]  ;;  %v24_v26 = vld [vmem:[%s1672_s0 + $0x50] sm:$0xff]  ;;  %v25_v28 = vld [vmem:[%s1672_s0 + $0x58] sm:$0xff] }
   0xa   :  { %v56_v27 = vld [vmem:[%s1672_s0 + $0x150] sm:$0xff]  ;;  %v57_v29 = vld [vmem:[%s1672_s0 + $0x158] sm:$0xff]  ;;  %v26_v30 = vld [vmem:[%s1672_s0 + $0x60] sm:$0xff] }
   0xb   :  { %v58_v31 = vld [vmem:[%s1672_s0 + $0x160] sm:$0xff]  ;;  %v27_v32 = vld [vmem:[%s1672_s0 + $0x68] sm:$0xff]  ;;  %v28_v34 = vld [vmem:[%s1672_s0 + $0x70] sm:$0xff] }
   0xc   :  { %947 = vmatmul.mubr.msk.f32.vlgmr.msra.gmra.mrb[0].mxu0 %vm89_vm1, %v15_v8  ;;  %995 = vmatmul.mubr.msk.f32.vlgmr.msra.gmra.mrb[0].mxu1 %vm89_vm1, %v47_v9  ;;  %v59_v33 = vld [vmem:[%s1672_s0 + $0x168] sm:$0xff]  ;;  %v60_v35 = vld [vmem:[%s1672_s0 + $0x170] sm:$0xff]  ;;  %v29_v36 = vld [vmem:[%s1672_s0 + $0x78] sm:$0xff] }
   0xd   :  { %949 = vmatprep.mubr.msk.f32.mxu0 %vm89_vm1, %v16_v10  ;;  %997 = vmatprep.mubr.msk.f32.mxu1 %vm89_vm1, %v48_v11  ;;  %v61_v37 = vld [vmem:[%s1672_s0 + $0x178] sm:$0xff]  ;;  %v30_v38 = vld [vmem:[%s1672_s0 + $0x80] sm:$0xff]  ;;  %v31_v40 = vld [vmem:[%s1672_s0 + $0x88] sm:$0xff] }
   0xe   :  { %v62_v39 = vld [vmem:[%s1672_s0 + $0x180] sm:$0xff]  ;;  %v63_v41 = vld [vmem:[%s1672_s0 + $0x188] sm:$0xff]  ;;  %v32_v42 = vld [vmem:[%s1672_s0 + $0x90] sm:$0xff] }
   0xf   :  { %v64_v43 = vld [vmem:[%s1672_s0 + $0x190] sm:$0xff]  ;;  %v33_v44 = vld [vmem:[%s1672_s0 + $0x98] sm:$0xff]  ;;  %v34_v46 = vld [vmem:[%s1672_s0 + $0xa0] sm:$0xff] }
  0x10   :  { %950 = vmatmul.mubr.msk.f32.gmra.mrb[2].mxu0 %vm89_vm1, %v17_v12  ;;  %998 = vmatmul.mubr.msk.f32.gmra.mrb[2].mxu1 %vm89_vm1, %v49_v13  ;;  %v65_v45 = vld [vmem:[%s1672_s0 + $0x198] sm:$0xff]  ;;  %v66_v47 = vld [vmem:[%s1672_s0 + $0x1a0] sm:$0xff]  ;;  %v35_v48 = vld [vmem:[%s1672_s0 + $0xa8] sm:$0xff] }
  0x11   :  { %952 = vmatprep.mubr.msk.f32.mxu0 %vm89_vm1, %v18_v14  ;;  %1000 = vmatprep.mubr.msk.f32.mxu1 %vm89_vm1, %v50_v15  ;;  %v67_v49 = vld [vmem:[%s1672_s0 + $0x1a8] sm:$0xff]  ;;  %v36_v50 = vld [vmem:[%s1672_s0 + $0xb0] sm:$0xff]  ;;  %v37_v52 = vld [vmem:[%s1672_s0 + $0xb8] sm:$0xff] }
  0x12   :  { %v68_v51 = vld [vmem:[%s1672_s0 + $0x1b0] sm:$0xff]  ;;  %v69_v53 = vld [vmem:[%s1672_s0 + $0x1b8] sm:$0xff]  ;;  %v38_v54 = vld [vmem:[%s1672_s0 + $0xc0] sm:$0xff] }
  0x13   :  { %v70_v55 = vld [vmem:[%s1672_s0 + $0x1c0] sm:$0xff]  ;;  %v39_v56 = vld [vmem:[%s1672_s0 + $0xc8] sm:$0xff]  ;;  %v40_v58 = vld [vmem:[%s1672_s0 + $0xd0] sm:$0xff] }
  0x14   :  { %953 = vmatmul.mubr.msk.f32.gmra.mrb[4].mxu0 %vm89_vm1, %v19_v16  ;;  %1001 = vmatmul.mubr.msk.f32.gmra.mrb[4].mxu1 %vm89_vm1, %v51_v17  ;;  %v71_v57 = vld [vmem:[%s1672_s0 + $0x1c8] sm:$0xff]  ;;  %v72_v59 = vld [vmem:[%s1672_s0 + $0x1d0] sm:$0xff]  ;;  %v41_v60 = vld [vmem:[%s1672_s0 + $0xd8] sm:$0xff] }
  0x15   :  { %955 = vmatprep.mubr.msk.f32.mxu0 %vm89_vm1, %v20_v18  ;;  %1003 = vmatprep.mubr.msk.f32.mxu1 %vm89_vm1, %v52_v19  ;;  %v73_v61 = vld [vmem:[%s1672_s0 + $0x1d8] sm:$0xff]  ;;  %v42_v62 = vld [vmem:[%s1672_s0 + $0xe0] sm:$0xff]  ;;  %v43_v0 = vld [vmem:[%s1672_s0 + $0xe8] sm:$0xff] }
  0x16   :  { %v74_v63 = vld [vmem:[%s1672_s0 + $0x1e0] sm:$0xff]  ;;  %v75_v1 = vld [vmem:[%s1672_s0 + $0x1e8] sm:$0xff]  ;;  %v44_v2 = vld [vmem:[%s1672_s0 + $0xf0] sm:$0xff] }
  0x17   :  { %v76_v3 = vld [vmem:[%s1672_s0 + $0x1f0] sm:$0xff]  ;;  %v45_v4 = vld [vmem:[%s1672_s0 + $0xf8] sm:$0xff]  ;;  %v1349_v6 = vld [vmem:[%s1673_s2] ss:$0 sm:$0xff] }
  0x18   :  { %956 = vmatmul.mubr.msk.f32.gmra.mrb[6].mxu0 %vm89_vm1, %v21_v20  ;;  %1004 = vmatmul.mubr.msk.f32.gmra.mrb[6].mxu1 %vm89_vm1, %v53_v21  ;;  %v77_v5 = vld [vmem:[%s1672_s0 + $0x1f8] sm:$0xff] }
  0x19   :  { %958 = vmatprep.mubr.msk.f32.mxu0 %vm89_vm1, %v22_v22  ;;  %1006 = vmatprep.mubr.msk.f32.mxu1 %vm89_vm1, %v54_v23 }
  0x1c   :  { %959 = vmatmul.mubr.msk.f32.gmra.mrb[8].mxu0 %vm89_vm1, %v23_v24  ;;  %1007 = vmatmul.mubr.msk.f32.gmra.mrb[8].mxu1 %vm89_vm1, %v55_v25 }
  0x1d   :  { %961 = vmatprep.mubr.msk.f32.mxu0 %vm89_vm1, %v24_v26  ;;  %1009 = vmatprep.mubr.msk.f32.mxu1 %vm89_vm1, %v56_v27 }
  0x20   :  { %962 = vmatmul.mubr.msk.f32.gmra.mrb[10].mxu0 %vm89_vm1, %v25_v28  ;;  %1010 = vmatmul.mubr.msk.f32.gmra.mrb[10].mxu1 %vm89_vm1, %v57_v29 }
  0x21   :  { %964 = vmatprep.mubr.msk.f32.mxu0 %vm89_vm1, %v26_v30  ;;  %1012 = vmatprep.mubr.msk.f32.mxu1 %vm89_vm1, %v58_v31 }
  0x24   :  { %965 = vmatmul.mubr.msk.f32.gmra.mrb[12].mxu0 %vm89_vm1, %v27_v32  ;;  %1013 = vmatmul.mubr.msk.f32.gmra.mrb[12].mxu1 %vm89_vm1, %v59_v33 }
  0x25   :  { %967 = vmatprep.mubr.msk.f32.mxu0 %vm89_vm1, %v28_v34  ;;  %1015 = vmatprep.mubr.msk.f32.mxu1 %vm89_vm1, %v60_v35 }
  0x28   :  { %968 = vmatmul.mubr.msk.f32.gmra.mrb[14].mxu0 %vm89_vm1, %v29_v36  ;;  %1016 = vmatmul.mubr.msk.f32.gmra.mrb[14].mxu1 %vm89_vm1, %v61_v37 }
  0x29   :  { %970 = vmatprep.mubr.msk.f32.mxu0 %vm89_vm1, %v30_v38  ;;  %1018 = vmatprep.mubr.msk.f32.mxu1 %vm89_vm1, %v62_v39 }
  0x2c   :  { %971 = vmatmul.mubr.msk.f32.gmra.mrb[16].mxu0 %vm89_vm1, %v31_v40  ;;  %1019 = vmatmul.mubr.msk.f32.gmra.mrb[16].mxu1 %vm89_vm1, %v63_v41 }
  0x2d   :  { %973 = vmatprep.mubr.msk.f32.mxu0 %vm89_vm1, %v32_v42  ;;  %1021 = vmatprep.mubr.msk.f32.mxu1 %vm89_vm1, %v64_v43 }
  0x30   :  { %974 = vmatmul.mubr.msk.f32.gmra.mrb[18].mxu0 %vm89_vm1, %v33_v44  ;;  %1022 = vmatmul.mubr.msk.f32.gmra.mrb[18].mxu1 %vm89_vm1, %v65_v45 }
  0x31   :  { %976 = vmatprep.mubr.msk.f32.mxu0 %vm89_vm1, %v34_v46  ;;  %1024 = vmatprep.mubr.msk.f32.mxu1 %vm89_vm1, %v66_v47 }
  0x34   :  { %977 = vmatmul.mubr.msk.f32.gmra.mrb[20].mxu0 %vm89_vm1, %v35_v48  ;;  %1025 = vmatmul.mubr.msk.f32.gmra.mrb[20].mxu1 %vm89_vm1, %v67_v49 }
  0x35   :  { %979 = vmatprep.mubr.msk.f32.mxu0 %vm89_vm1, %v36_v50  ;;  %1027 = vmatprep.mubr.msk.f32.mxu1 %vm89_vm1, %v68_v51 }
  0x38   :  { %980 = vmatmul.mubr.msk.f32.gmra.mrb[22].mxu0 %vm89_vm1, %v37_v52  ;;  %1028 = vmatmul.mubr.msk.f32.gmra.mrb[22].mxu1 %vm89_vm1, %v69_v53 }
  0x39   :  { %982 = vmatprep.mubr.msk.f32.mxu0 %vm89_vm1, %v38_v54  ;;  %1030 = vmatprep.mubr.msk.f32.mxu1 %vm89_vm1, %v70_v55 }
  0x3c   :  { %983 = vmatmul.mubr.msk.f32.gmra.mrb[24].mxu0 %vm89_vm1, %v39_v56  ;;  %1031 = vmatmul.mubr.msk.f32.gmra.mrb[24].mxu1 %vm89_vm1, %v71_v57 }
  0x3d   :  { %985 = vmatprep.mubr.msk.f32.mxu0 %vm89_vm1, %v40_v58  ;;  %1033 = vmatprep.mubr.msk.f32.mxu1 %vm89_vm1, %v72_v59 }
  0x40   :  { %986 = vmatmul.mubr.msk.f32.gmra.mrb[26].mxu0 %vm89_vm1, %v41_v60  ;;  %1034 = vmatmul.mubr.msk.f32.gmra.mrb[26].mxu1 %vm89_vm1, %v73_v61 }
  0x41   :  { %988 = vmatprep.mubr.msk.f32.mxu0 %vm89_vm1, %v42_v62  ;;  %1036 = vmatprep.mubr.msk.f32.mxu1 %vm89_vm1, %v74_v63 }
  0x44   :  { %989 = vmatmul.mubr.msk.f32.gmra.mrb[28].mxu0 %vm89_vm1, %v43_v0  ;;  %1037 = vmatmul.mubr.msk.f32.gmra.mrb[28].mxu1 %vm89_vm1, %v75_v1 }
  0x45   :  { %991 = vmatprep.mubr.msk.f32.mxu0 %vm89_vm1, %v44_v2  ;;  %1039 = vmatprep.mubr.msk.f32.mxu1 %vm89_vm1, %v76_v3 }
  0x48   :  { %992 = vmatmul.mubr.msk.f32.gmra.mrb[30].mxu0 %vm89_vm1, %v45_v4  ;;  %1040 = vmatmul.mubr.msk.f32.gmra.mrb[30].mxu1 %vm89_vm1, %v77_v5 }
  0xdf   :  { %v948_v7 = vpop.f32.mrb[0].mxu0  ;;  %v996_v8 = vpop.f32.mrb[0].mxu1 }
  0xe0   :  { %v358_v9 = vadd.f32 %v948_v7, %v1349_v6  ;;  %v518_v10 = vadd.f32 %v996_v8, %v1349_v6  ;;  %v352_v11 = vpop.f32.mrb[1].mxu0  ;;  %v512_v12 = vpop.f32.mrb[1].mxu1 }
  0xe1   :  { %v353_v13 = vadd.f32 %v1349_v6, %v352_v11  ;;  %v513_v14 = vadd.f32 %v1349_v6, %v512_v12 }
  0xe2   :  { %v672_v15 = vmax.f32 %v358_v9, 0.0  ;;  %v704_v16 = vmax.f32 %v518_v10, 0.0 }
  0xe3   :  { %v671_v17 = vmax.f32 %v353_v13, 0.0  ;;  %v703_v18 = vmax.f32 %v513_v14, 0.0  ;;  %v951_v19 = vpop.f32.mrb[2].mxu0  ;;  %v999_v20 = vpop.f32.mrb[2].mxu1 }
  0xe4   :  { %737 = vst.msk [vmem:[%s1674_s3 + $0x8] sm:$0xff] %vm735_vm4, %v672_v15  ;;  %769 = vst.msk [vmem:[%s1674_s3 + $0x108] sm:$0xff] %vm735_vm4, %v704_v16  ;;  %v368_v21 = vadd.f32 %v951_v19, %v1349_v6  ;;  %v528_v22 = vadd.f32 %v999_v20, %v1349_v6  ;;  %v362_v23 = vpop.f32.mrb[3].mxu0  ;;  %v522_v24 = vpop.f32.mrb[3].mxu1 }
  0xe5   :  { %736 = vst.msk [vmem:[%s1674_s3] sm:$0xff] %vm735_vm4, %v671_v17  ;;  %768 = vst.msk [vmem:[%s1674_s3 + $0x100] sm:$0xff] %vm735_vm4, %v703_v18  ;;  %v363_v25 = vadd.f32 %v1349_v6, %v362_v23  ;;  %v523_v26 = vadd.f32 %v1349_v6, %v522_v24 }
  0xe6   :  { %v674_v27 = vmax.f32 %v368_v21, 0.0  ;;  %v706_v28 = vmax.f32 %v528_v22, 0.0 }
  0xe7   :  { %v673_v29 = vmax.f32 %v363_v25, 0.0  ;;  %v705_v30 = vmax.f32 %v523_v26, 0.0  ;;  %v954_v31 = vpop.f32.mrb[4].mxu0  ;;  %v1002_v32 = vpop.f32.mrb[4].mxu1 }
  0xe8   :  { %739 = vst.msk [vmem:[%s1674_s3 + $0x18] sm:$0xff] %vm735_vm4, %v674_v27  ;;  %771 = vst.msk [vmem:[%s1674_s3 + $0x118] sm:$0xff] %vm735_vm4, %v706_v28  ;;  %v378_v33 = vadd.f32 %v954_v31, %v1349_v6  ;;  %v538_v34 = vadd.f32 %v1002_v32, %v1349_v6  ;;  %v372_v35 = vpop.f32.mrb[5].mxu0  ;;  %v532_v36 = vpop.f32.mrb[5].mxu1 }
  0xe9   :  { %738 = vst.msk [vmem:[%s1674_s3 + $0x10] sm:$0xff] %vm735_vm4, %v673_v29  ;;  %770 = vst.msk [vmem:[%s1674_s3 + $0x110] sm:$0xff] %vm735_vm4, %v705_v30  ;;  %v373_v37 = vadd.f32 %v1349_v6, %v372_v35  ;;  %v533_v38 = vadd.f32 %v1349_v6, %v532_v36 }
  0xea   :  { %v676_v39 = vmax.f32 %v378_v33, 0.0  ;;  %v708_v40 = vmax.f32 %v538_v34, 0.0 }
  0xeb   :  { %v675_v41 = vmax.f32 %v373_v37, 0.0  ;;  %v707_v42 = vmax.f32 %v533_v38, 0.0  ;;  %v957_v43 = vpop.f32.mrb[6].mxu0  ;;  %v1005_v44 = vpop.f32.mrb[6].mxu1 }
  0xec   :  { %741 = vst.msk [vmem:[%s1674_s3 + $0x28] sm:$0xff] %vm735_vm4, %v676_v39  ;;  %773 = vst.msk [vmem:[%s1674_s3 + $0x128] sm:$0xff] %vm735_vm4, %v708_v40  ;;  %v388_v45 = vadd.f32 %v957_v43, %v1349_v6  ;;  %v548_v46 = vadd.f32 %v1005_v44, %v1349_v6  ;;  %v382_v47 = vpop.f32.mrb[7].mxu0  ;;  %v542_v48 = vpop.f32.mrb[7].mxu1 }
  0xed   :  { %740 = vst.msk [vmem:[%s1674_s3 + $0x20] sm:$0xff] %vm735_vm4, %v675_v41  ;;  %772 = vst.msk [vmem:[%s1674_s3 + $0x120] sm:$0xff] %vm735_vm4, %v707_v42  ;;  %v383_v49 = vadd.f32 %v1349_v6, %v382_v47  ;;  %v543_v50 = vadd.f32 %v1349_v6, %v542_v48 }
  0xee   :  { %v678_v51 = vmax.f32 %v388_v45, 0.0  ;;  %v710_v52 = vmax.f32 %v548_v46, 0.0 }
  0xef   :  { %v677_v53 = vmax.f32 %v383_v49, 0.0  ;;  %v709_v54 = vmax.f32 %v543_v50, 0.0  ;;  %v960_v55 = vpop.f32.mrb[8].mxu0  ;;  %v1008_v56 = vpop.f32.mrb[8].mxu1 }
  0xf0   :  { %743 = vst.msk [vmem:[%s1674_s3 + $0x38] sm:$0xff] %vm735_vm4, %v678_v51  ;;  %775 = vst.msk [vmem:[%s1674_s3 + $0x138] sm:$0xff] %vm735_vm4, %v710_v52  ;;  %v398_v57 = vadd.f32 %v960_v55, %v1349_v6  ;;  %v558_v58 = vadd.f32 %v1008_v56, %v1349_v6  ;;  %v392_v59 = vpop.f32.mrb[9].mxu0  ;;  %v552_v60 = vpop.f32.mrb[9].mxu1 }
  0xf1   :  { %742 = vst.msk [vmem:[%s1674_s3 + $0x30] sm:$0xff] %vm735_vm4, %v677_v53  ;;  %774 = vst.msk [vmem:[%s1674_s3 + $0x130] sm:$0xff] %vm735_vm4, %v709_v54  ;;  %v393_v61 = vadd.f32 %v1349_v6, %v392_v59  ;;  %v553_v62 = vadd.f32 %v1349_v6, %v552_v60 }
  0xf2   :  { %v680_v63 = vmax.f32 %v398_v57, 0.0  ;;  %v712_v0 = vmax.f32 %v558_v58, 0.0 }
  0xf3   :  { %v679_v1 = vmax.f32 %v393_v61, 0.0  ;;  %v711_v2 = vmax.f32 %v553_v62, 0.0  ;;  %v963_v3 = vpop.f32.mrb[10].mxu0  ;;  %v1011_v4 = vpop.f32.mrb[10].mxu1 }
  0xf4   :  { %745 = vst.msk [vmem:[%s1674_s3 + $0x48] sm:$0xff] %vm735_vm4, %v680_v63  ;;  %777 = vst.msk [vmem:[%s1674_s3 + $0x148] sm:$0xff] %vm735_vm4, %v712_v0  ;;  %v408_v5 = vadd.f32 %v963_v3, %v1349_v6  ;;  %v568_v7 = vadd.f32 %v1011_v4, %v1349_v6  ;;  %v402_v8 = vpop.f32.mrb[11].mxu0  ;;  %v562_v9 = vpop.f32.mrb[11].mxu1 }
  0xf5   :  { %744 = vst.msk [vmem:[%s1674_s3 + $0x40] sm:$0xff] %vm735_vm4, %v679_v1  ;;  %776 = vst.msk [vmem:[%s1674_s3 + $0x140] sm:$0xff] %vm735_vm4, %v711_v2  ;;  %v403_v10 = vadd.f32 %v1349_v6, %v402_v8  ;;  %v563_v11 = vadd.f32 %v1349_v6, %v562_v9 }
  0xf6   :  { %v682_v12 = vmax.f32 %v408_v5, 0.0  ;;  %v714_v13 = vmax.f32 %v568_v7, 0.0 }
  0xf7   :  { %v681_v14 = vmax.f32 %v403_v10, 0.0  ;;  %v713_v15 = vmax.f32 %v563_v11, 0.0  ;;  %v966_v16 = vpop.f32.mrb[12].mxu0  ;;  %v1014_v17 = vpop.f32.mrb[12].mxu1 }
  0xf8   :  { %747 = vst.msk [vmem:[%s1674_s3 + $0x58] sm:$0xff] %vm735_vm4, %v682_v12  ;;  %779 = vst.msk [vmem:[%s1674_s3 + $0x158] sm:$0xff] %vm735_vm4, %v714_v13  ;;  %v418_v18 = vadd.f32 %v966_v16, %v1349_v6  ;;  %v578_v19 = vadd.f32 %v1014_v17, %v1349_v6  ;;  %v412_v20 = vpop.f32.mrb[13].mxu0  ;;  %v572_v21 = vpop.f32.mrb[13].mxu1 }
  0xf9   :  { %746 = vst.msk [vmem:[%s1674_s3 + $0x50] sm:$0xff] %vm735_vm4, %v681_v14  ;;  %778 = vst.msk [vmem:[%s1674_s3 + $0x150] sm:$0xff] %vm735_vm4, %v713_v15  ;;  %v413_v22 = vadd.f32 %v1349_v6, %v412_v20  ;;  %v573_v23 = vadd.f32 %v1349_v6, %v572_v21 }
  0xfa   :  { %v684_v24 = vmax.f32 %v418_v18, 0.0  ;;  %v716_v25 = vmax.f32 %v578_v19, 0.0 }
  0xfb   :  { %v683_v26 = vmax.f32 %v413_v22, 0.0  ;;  %v715_v27 = vmax.f32 %v573_v23, 0.0  ;;  %v969_v28 = vpop.f32.mrb[14].mxu0  ;;  %v1017_v29 = vpop.f32.mrb[14].mxu1 }
  0xfc   :  { %749 = vst.msk [vmem:[%s1674_s3 + $0x68] sm:$0xff] %vm735_vm4, %v684_v24  ;;  %781 = vst.msk [vmem:[%s1674_s3 + $0x168] sm:$0xff] %vm735_vm4, %v716_v25  ;;  %v428_v30 = vadd.f32 %v969_v28, %v1349_v6  ;;  %v588_v31 = vadd.f32 %v1017_v29, %v1349_v6  ;;  %v422_v32 = vpop.f32.mrb[15].mxu0  ;;  %v582_v33 = vpop.f32.mrb[15].mxu1 }
  0xfd   :  { %748 = vst.msk [vmem:[%s1674_s3 + $0x60] sm:$0xff] %vm735_vm4, %v683_v26  ;;  %780 = vst.msk [vmem:[%s1674_s3 + $0x160] sm:$0xff] %vm735_vm4, %v715_v27  ;;  %v423_v34 = vadd.f32 %v1349_v6, %v422_v32  ;;  %v583_v35 = vadd.f32 %v1349_v6, %v582_v33 }
  0xfe   :  { %v686_v36 = vmax.f32 %v428_v30, 0.0  ;;  %v718_v37 = vmax.f32 %v588_v31, 0.0 }
  0xff   :  { %v685_v38 = vmax.f32 %v423_v34, 0.0  ;;  %v717_v39 = vmax.f32 %v583_v35, 0.0  ;;  %v972_v40 = vpop.f32.mrb[16].mxu0  ;;  %v1020_v41 = vpop.f32.mrb[16].mxu1 }
 0x100   :  { %751 = vst.msk [vmem:[%s1674_s3 + $0x78] sm:$0xff] %vm735_vm4, %v686_v36  ;;  %783 = vst.msk [vmem:[%s1674_s3 + $0x178] sm:$0xff] %vm735_vm4, %v718_v37  ;;  %v438_v42 = vadd.f32 %v972_v40, %v1349_v6  ;;  %v598_v43 = vadd.f32 %v1020_v41, %v1349_v6  ;;  %v432_v44 = vpop.f32.mrb[17].mxu0  ;;  %v592_v45 = vpop.f32.mrb[17].mxu1 }
 0x101   :  { %750 = vst.msk [vmem:[%s1674_s3 + $0x70] sm:$0xff] %vm735_vm4, %v685_v38  ;;  %782 = vst.msk [vmem:[%s1674_s3 + $0x170] sm:$0xff] %vm735_vm4, %v717_v39  ;;  %v433_v46 = vadd.f32 %v1349_v6, %v432_v44  ;;  %v593_v47 = vadd.f32 %v1349_v6, %v592_v45 }
 0x102   :  { %v688_v48 = vmax.f32 %v438_v42, 0.0  ;;  %v720_v49 = vmax.f32 %v598_v43, 0.0 }
 0x103   :  { %v687_v50 = vmax.f32 %v433_v46, 0.0  ;;  %v719_v51 = vmax.f32 %v593_v47, 0.0  ;;  %v975_v52 = vpop.f32.mrb[18].mxu0  ;;  %v1023_v53 = vpop.f32.mrb[18].mxu1 }
 0x104   :  { %753 = vst.msk [vmem:[%s1674_s3 + $0x88] sm:$0xff] %vm735_vm4, %v688_v48  ;;  %785 = vst.msk [vmem:[%s1674_s3 + $0x188] sm:$0xff] %vm735_vm4, %v720_v49  ;;  %v448_v54 = vadd.f32 %v975_v52, %v1349_v6  ;;  %v608_v55 = vadd.f32 %v1023_v53, %v1349_v6  ;;  %v442_v56 = vpop.f32.mrb[19].mxu0  ;;  %v602_v57 = vpop.f32.mrb[19].mxu1 }
 0x105   :  { %752 = vst.msk [vmem:[%s1674_s3 + $0x80] sm:$0xff] %vm735_vm4, %v687_v50  ;;  %784 = vst.msk [vmem:[%s1674_s3 + $0x180] sm:$0xff] %vm735_vm4, %v719_v51  ;;  %v443_v58 = vadd.f32 %v1349_v6, %v442_v56  ;;  %v603_v59 = vadd.f32 %v1349_v6, %v602_v57 }
 0x106   :  { %v690_v60 = vmax.f32 %v448_v54, 0.0  ;;  %v722_v61 = vmax.f32 %v608_v55, 0.0 }
 0x107   :  { %v689_v62 = vmax.f32 %v443_v58, 0.0  ;;  %v721_v63 = vmax.f32 %v603_v59, 0.0  ;;  %v978_v0 = vpop.f32.mrb[20].mxu0  ;;  %v1026_v1 = vpop.f32.mrb[20].mxu1 }
 0x108   :  { %755 = vst.msk [vmem:[%s1674_s3 + $0x98] sm:$0xff] %vm735_vm4, %v690_v60  ;;  %787 = vst.msk [vmem:[%s1674_s3 + $0x198] sm:$0xff] %vm735_vm4, %v722_v61  ;;  %v458_v2 = vadd.f32 %v978_v0, %v1349_v6  ;;  %v618_v3 = vadd.f32 %v1026_v1, %v1349_v6  ;;  %v452_v4 = vpop.f32.mrb[21].mxu0  ;;  %v612_v5 = vpop.f32.mrb[21].mxu1 }
 0x109   :  { %754 = vst.msk [vmem:[%s1674_s3 + $0x90] sm:$0xff] %vm735_vm4, %v689_v62  ;;  %786 = vst.msk [vmem:[%s1674_s3 + $0x190] sm:$0xff] %vm735_vm4, %v721_v63  ;;  %v453_v7 = vadd.f32 %v1349_v6, %v452_v4  ;;  %v613_v8 = vadd.f32 %v1349_v6, %v612_v5 }
 0x10a   :  { %v692_v9 = vmax.f32 %v458_v2, 0.0  ;;  %v724_v10 = vmax.f32 %v618_v3, 0.0 }
 0x10b   :  { %v691_v11 = vmax.f32 %v453_v7, 0.0  ;;  %v723_v12 = vmax.f32 %v613_v8, 0.0  ;;  %v981_v13 = vpop.f32.mrb[22].mxu0  ;;  %v1029_v14 = vpop.f32.mrb[22].mxu1 }
 0x10c   :  { %757 = vst.msk [vmem:[%s1674_s3 + $0xa8] sm:$0xff] %vm735_vm4, %v692_v9  ;;  %789 = vst.msk [vmem:[%s1674_s3 + $0x1a8] sm:$0xff] %vm735_vm4, %v724_v10  ;;  %v468_v15 = vadd.f32 %v981_v13, %v1349_v6  ;;  %v628_v16 = vadd.f32 %v1029_v14, %v1349_v6  ;;  %v462_v17 = vpop.f32.mrb[23].mxu0  ;;  %v622_v18 = vpop.f32.mrb[23].mxu1 }
 0x10d   :  { %756 = vst.msk [vmem:[%s1674_s3 + $0xa0] sm:$0xff] %vm735_vm4, %v691_v11  ;;  %788 = vst.msk [vmem:[%s1674_s3 + $0x1a0] sm:$0xff] %vm735_vm4, %v723_v12  ;;  %v463_v19 = vadd.f32 %v1349_v6, %v462_v17  ;;  %v623_v20 = vadd.f32 %v1349_v6, %v622_v18 }
 0x10e   :  { %v694_v21 = vmax.f32 %v468_v15, 0.0  ;;  %v726_v22 = vmax.f32 %v628_v16, 0.0 }
 0x10f   :  { %v693_v23 = vmax.f32 %v463_v19, 0.0  ;;  %v725_v24 = vmax.f32 %v623_v20, 0.0  ;;  %v984_v25 = vpop.f32.mrb[24].mxu0  ;;  %v1032_v26 = vpop.f32.mrb[24].mxu1 }
 0x110   :  { %759 = vst.msk [vmem:[%s1674_s3 + $0xb8] sm:$0xff] %vm735_vm4, %v694_v21  ;;  %791 = vst.msk [vmem:[%s1674_s3 + $0x1b8] sm:$0xff] %vm735_vm4, %v726_v22  ;;  %v478_v27 = vadd.f32 %v984_v25, %v1349_v6  ;;  %v638_v28 = vadd.f32 %v1032_v26, %v1349_v6  ;;  %v472_v29 = vpop.f32.mrb[25].mxu0  ;;  %v632_v30 = vpop.f32.mrb[25].mxu1 }
 0x111   :  { %758 = vst.msk [vmem:[%s1674_s3 + $0xb0] sm:$0xff] %vm735_vm4, %v693_v23  ;;  %790 = vst.msk [vmem:[%s1674_s3 + $0x1b0] sm:$0xff] %vm735_vm4, %v725_v24  ;;  %v473_v31 = vadd.f32 %v1349_v6, %v472_v29  ;;  %v633_v32 = vadd.f32 %v1349_v6, %v632_v30 }
 0x112   :  { %v696_v33 = vmax.f32 %v478_v27, 0.0  ;;  %v728_v34 = vmax.f32 %v638_v28, 0.0 }
 0x113   :  { %v695_v35 = vmax.f32 %v473_v31, 0.0  ;;  %v727_v36 = vmax.f32 %v633_v32, 0.0  ;;  %v987_v37 = vpop.f32.mrb[26].mxu0  ;;  %v1035_v38 = vpop.f32.mrb[26].mxu1 }
 0x114   :  { %761 = vst.msk [vmem:[%s1674_s3 + $0xc8] sm:$0xff] %vm735_vm4, %v696_v33  ;;  %793 = vst.msk [vmem:[%s1674_s3 + $0x1c8] sm:$0xff] %vm735_vm4, %v728_v34  ;;  %v488_v39 = vadd.f32 %v987_v37, %v1349_v6  ;;  %v648_v40 = vadd.f32 %v1035_v38, %v1349_v6  ;;  %v482_v41 = vpop.f32.mrb[27].mxu0  ;;  %v642_v42 = vpop.f32.mrb[27].mxu1 }
 0x115   :  { %760 = vst.msk [vmem:[%s1674_s3 + $0xc0] sm:$0xff] %vm735_vm4, %v695_v35  ;;  %792 = vst.msk [vmem:[%s1674_s3 + $0x1c0] sm:$0xff] %vm735_vm4, %v727_v36  ;;  %v483_v43 = vadd.f32 %v1349_v6, %v482_v41  ;;  %v643_v44 = vadd.f32 %v1349_v6, %v642_v42 }
 0x116   :  { %v698_v45 = vmax.f32 %v488_v39, 0.0  ;;  %v730_v46 = vmax.f32 %v648_v40, 0.0 }
 0x117   :  { %v697_v47 = vmax.f32 %v483_v43, 0.0  ;;  %v729_v48 = vmax.f32 %v643_v44, 0.0  ;;  %v990_v49 = vpop.f32.mrb[28].mxu0  ;;  %v1038_v50 = vpop.f32.mrb[28].mxu1 }
 0x118   :  { %763 = vst.msk [vmem:[%s1674_s3 + $0xd8] sm:$0xff] %vm735_vm4, %v698_v45  ;;  %795 = vst.msk [vmem:[%s1674_s3 + $0x1d8] sm:$0xff] %vm735_vm4, %v730_v46  ;;  %v498_v51 = vadd.f32 %v990_v49, %v1349_v6  ;;  %v658_v52 = vadd.f32 %v1038_v50, %v1349_v6  ;;  %v492_v53 = vpop.f32.mrb[29].mxu0  ;;  %v652_v54 = vpop.f32.mrb[29].mxu1 }
 0x119   :  { %762 = vst.msk [vmem:[%s1674_s3 + $0xd0] sm:$0xff] %vm735_vm4, %v697_v47  ;;  %794 = vst.msk [vmem:[%s1674_s3 + $0x1d0] sm:$0xff] %vm735_vm4, %v729_v48  ;;  %v493_v55 = vadd.f32 %v1349_v6, %v492_v53  ;;  %v653_v56 = vadd.f32 %v1349_v6, %v652_v54 }
 0x11a   :  { %v700_v57 = vmax.f32 %v498_v51, 0.0  ;;  %v732_v58 = vmax.f32 %v658_v52, 0.0 }
 0x11b   :  { %v699_v59 = vmax.f32 %v493_v55, 0.0  ;;  %v731_v60 = vmax.f32 %v653_v56, 0.0  ;;  %v993_v61 = vpop.f32.mrb[30].mxu0  ;;  %v1041_v62 = vpop.f32.mrb[30].mxu1 }
 0x11c   :  { %765 = vst.msk [vmem:[%s1674_s3 + $0xe8] sm:$0xff] %vm735_vm4, %v700_v57  ;;  %797 = vst.msk [vmem:[%s1674_s3 + $0x1e8] sm:$0xff] %vm735_vm4, %v732_v58  ;;  %v508_v63 = vadd.f32 %v993_v61, %v1349_v6  ;;  %v668_v0 = vadd.f32 %v1041_v62, %v1349_v6  ;;  %v502_v1 = vpop.f32.mrb[31].mxu0  ;;  %v662_v2 = vpop.f32.mrb[31].mxu1 }
 0x11d   :  { %764 = vst.msk [vmem:[%s1674_s3 + $0xe0] sm:$0xff] %vm735_vm4, %v699_v59  ;;  %796 = vst.msk [vmem:[%s1674_s3 + $0x1e0] sm:$0xff] %vm735_vm4, %v731_v60  ;;  %v503_v3 = vadd.f32 %v1349_v6, %v502_v1  ;;  %v663_v4 = vadd.f32 %v1349_v6, %v662_v2 }
 0x11e   :  { %v702_v5 = vmax.f32 %v508_v63, 0.0  ;;  %v734_v7 = vmax.f32 %v668_v0, 0.0 }
 0x11f   :  { %v701_v8 = vmax.f32 %v503_v3, 0.0  ;;  %v733_v9 = vmax.f32 %v663_v4, 0.0 }
 0x120   :  { %767 = vst.msk [vmem:[%s1674_s3 + $0xf8] sm:$0xff] %vm735_vm4, %v702_v5  ;;  %799 = vst.msk [vmem:[%s1674_s3 + $0x1f8] sm:$0xff] %vm735_vm4, %v734_v7 }
 0x121   :  { %766 = vst.msk [vmem:[%s1674_s3 + $0xf0] sm:$0xff] %vm735_vm4, %v701_v8  ;;  %798 = vst.msk [vmem:[%s1674_s3 + $0x1f0] sm:$0xff] %vm735_vm4, %v733_v9 }

</bundles_post_ra>
